<compile_context>
chip_gen: v5e
topology: v5e:2x2
jax: 0.10.0
libtpu: 0.0.40
codegen_flags: <defaults>
</compile_context>

<pallas_src>
import functools
import math

import jax
import jax.numpy as jnp
from jax.experimental import pallas as pl


def _mha_kernel(xin_ref, wqkv_ref, bqkv_ref, wo_ref, bo_ref, out_ref, *, h):
    """xin: (3, S, D) stacked [query, key, value]; wqkv: (3, D, D); bqkv: (3, 1, D)."""
    S, D = out_ref.shape
    d_k = D // h
    scale = 1.0 / math.sqrt(d_k)

    # Q/K/V projections (inputs may differ, so three 2-D matmuls, K = D = 32 each).
    q = jnp.dot(xin_ref[0], wqkv_ref[0], preferred_element_type=jnp.float32) + bqkv_ref[0]
    k = jnp.dot(xin_ref[1], wqkv_ref[1], preferred_element_type=jnp.float32) + bqkv_ref[1]
    v = jnp.dot(xin_ref[2], wqkv_ref[2], preferred_element_type=jnp.float32) + bqkv_ref[2]

    # Contract the last (minor) axis of both operands -> no materialized k.T.
    dn = (((1,), (1,)), ((), ()))

    # Static per-head unroll (h is tiny); everything stays inside this single
    # kernel invocation, so there is no per-head pipeline / DMA overhead.
    ctx_parts = []
    for head in range(h):
        lo = head * d_k
        qh = q[:, lo:lo + d_k] * scale          # fold 1/sqrt(d_k) into (S, d_k), not (S, S)
        kh = k[:, lo:lo + d_k]
        vh = v[:, lo:lo + d_k]

        scores = jax.lax.dot_general(qh, kh, dn, preferred_element_type=jnp.float32)
        # TODO(synk): mask support (masked_fill with -1e9) not wired up; test uses mask=None.
        scores = scores - jnp.max(scores, axis=-1, keepdims=True)
        p = jnp.exp(scores)
        denom = jnp.sum(p, axis=-1, keepdims=True)
        p = p * pl.reciprocal(denom, approx=True)   # EUP slot; frees VALU from the divide
        # TODO(synk): nn.Dropout(p=0.1) on p_attn omitted (eval-mode / identity semantics).

        ctx_parts.append(jnp.dot(p, vh, preferred_element_type=jnp.float32))

    ctx = jnp.concatenate(ctx_parts, axis=-1)        # (S, D)

    # Single output projection.
    out_ref[...] = (jnp.dot(ctx, wo_ref[...], preferred_element_type=jnp.float32)
                    + bo_ref[...]).astype(out_ref.dtype)


def multi_headed_attention(query, key, value, params, *, h):
    """query/key/value: (S, d_model) float32.  params: dict of math-layout weights."""
    S, D = query.shape
    assert D % h == 0

    # Wrapper-side fusion: 5 arrays total reach the kernel (vs 11 before), and no
    # per-head weight reshapes/transposes.
    xin = jnp.stack([query, key, value])                                    # (3, S, D)
    wqkv = jnp.stack([params["Wq"], params["Wk"], params["Wv"]])            # (3, D, D)
    bqkv = jnp.stack([params["bq"], params["bk"], params["bv"]]).reshape(3, 1, D)
    wo = params["Wo"]                                                       # (D, D)
    bo = params["bo"].reshape(1, D)

    kernel = functools.partial(_mha_kernel, h=h)
    return pl.pallas_call(
        kernel,
        out_shape=jax.ShapeDtypeStruct((S, D), query.dtype),
    )(xin, wqkv, bqkv, wo, bo)


def reference(query, key, value, params, *, h):
    """Pure-JAX reference matching the PyTorch forward (eval mode, mask=None)."""
    S, D = query.shape
    d_k = D // h
    q = query @ params["Wq"] + params["bq"]
    k = key @ params["Wk"] + params["bk"]
    v = value @ params["Wv"] + params["bv"]
    qh = q.reshape(S, h, d_k).transpose(1, 0, 2)
    kh = k.reshape(S, h, d_k).transpose(1, 0, 2)
    vh = v.reshape(S, h, d_k).transpose(1, 0, 2)
    scores = jnp.einsum("hqd,hkd->hqk", qh, kh) / math.sqrt(d_k)
    p = jax.nn.softmax(scores, axis=-1)
    ctx = jnp.einsum("hqk,hkd->hqd", p, vh)
    ctx = ctx.transpose(1, 0, 2).reshape(S, D)
    return ctx @ params["Wo"] + params["bo"]


if __name__ == "__main__":
    h = 4
    d_model = 32
    seq = 8

    key0 = jax.random.PRNGKey(0)
    keys = jax.random.split(key0, 12)
    scale = 1.0 / math.sqrt(d_model)

    # Deterministic synthetic parameters (math layout: y = x @ W + b).
    params = {
        "Wq": jax.random.normal(keys[0], (d_model, d_model), jnp.float32) * scale,
        "bq": jax.random.normal(keys[1], (d_model,), jnp.float32) * 0.01,
        "Wk": jax.random.normal(keys[2], (d_model, d_model), jnp.float32) * scale,
        "bk": jax.random.normal(keys[3], (d_model,), jnp.float32) * 0.01,
        "Wv": jax.random.normal(keys[4], (d_model, d_model), jnp.float32) * scale,
        "bv": jax.random.normal(keys[5], (d_model,), jnp.float32) * 0.01,
        "Wo": jax.random.normal(keys[6], (d_model, d_model), jnp.float32) * scale,
        "bo": jax.random.normal(keys[7], (d_model,), jnp.float32) * 0.01,
    }

    query = jax.random.normal(keys[8], (seq, d_model), jnp.float32)
    key_in = jax.random.normal(keys[9], (seq, d_model), jnp.float32)
    value = jax.random.normal(keys[10], (seq, d_model), jnp.float32)

    out = multi_headed_attention(query, key_in, value, params, h=h)
    out = jax.block_until_ready(out)

    ref = reference(query, key_in, value, params, h=h)
    assert out.shape == (seq, d_model)
    # Tolerance accounts for the EUP approximate reciprocal used in the softmax
    # normalization (small relative error vs exact f32 division).
    assert jnp.allclose(out, ref, atol=1e-2, rtol=1e-2), "mismatch vs reference"

    print("KERNEL_OK")
</pallas_src>

<mosaic_0001>
module attributes {stable_mosaic.version = 11 : i64} {
  func.func @_mha_kernel(%arg0: memref<3x8x32xf32, #tpu.memory_space<vmem>>, %arg1: memref<3x32x32xf32, #tpu.memory_space<vmem>>, %arg2: memref<3x1x32xf32, #tpu.memory_space<vmem>>, %arg3: memref<32x32xf32, #tpu.memory_space<vmem>>, %arg4: memref<1x32xf32, #tpu.memory_space<vmem>>, %arg5: memref<8x32xf32, #tpu.memory_space<vmem>>) attributes {dimension_semantics = [], scalar_prefetch = 0 : i64, scratch_operands = 0 : i64, tpu.core_type = #tpu.core_type<tc>} {
    %c0 = arith.constant 0 : index
    %c0_0 = arith.constant 0 : index
    %c0_1 = arith.constant 0 : index
    %0 = vector.load %arg0[%c0, %c0_0, %c0_1] : memref<3x8x32xf32, #tpu.memory_space<vmem>>, vector<1x8x32xf32>
    %1 = vector.shape_cast %0 : vector<1x8x32xf32> to vector<8x32xf32>
    %c0_2 = arith.constant 0 : index
    %c0_3 = arith.constant 0 : index
    %c0_4 = arith.constant 0 : index
    %2 = vector.load %arg1[%c0_2, %c0_3, %c0_4] : memref<3x32x32xf32, #tpu.memory_space<vmem>>, vector<1x32x32xf32>
    %3 = vector.shape_cast %2 : vector<1x32x32xf32> to vector<32x32xf32>
    %cst = arith.constant dense<0.000000e+00> : vector<8x32xf32>
    %4 = tpu.matmul %1, %3, %cst {dimension_numbers = #tpu.dot_dimension_numbers<[1], [0], [0], [1], [0, 0, 1, 1], [], []>} : vector<8x32xf32>, vector<32x32xf32>, vector<8x32xf32> -> vector<8x32xf32>
    %c0_5 = arith.constant 0 : index
    %c0_6 = arith.constant 0 : index
    %c0_7 = arith.constant 0 : index
    %5 = vector.load %arg2[%c0_5, %c0_6, %c0_7] : memref<3x1x32xf32, #tpu.memory_space<vmem>>, vector<1x1x32xf32>
    %6 = vector.shape_cast %5 : vector<1x1x32xf32> to vector<1x32xf32>
    %7 = vector.broadcast %6 : vector<1x32xf32> to vector<8x32xf32>
    %8 = arith.addf %4, %7 : vector<8x32xf32>
    %c1 = arith.constant 1 : index
    %c0_8 = arith.constant 0 : index
    %c0_9 = arith.constant 0 : index
    %9 = vector.load %arg0[%c1, %c0_8, %c0_9] : memref<3x8x32xf32, #tpu.memory_space<vmem>>, vector<1x8x32xf32>
    %10 = vector.shape_cast %9 : vector<1x8x32xf32> to vector<8x32xf32>
    %c1_10 = arith.constant 1 : index
    %c0_11 = arith.constant 0 : index
    %c0_12 = arith.constant 0 : index
    %11 = vector.load %arg1[%c1_10, %c0_11, %c0_12] : memref<3x32x32xf32, #tpu.memory_space<vmem>>, vector<1x32x32xf32>
    %12 = vector.shape_cast %11 : vector<1x32x32xf32> to vector<32x32xf32>
    %cst_13 = arith.constant dense<0.000000e+00> : vector<8x32xf32>
    %13 = tpu.matmul %10, %12, %cst_13 {dimension_numbers = #tpu.dot_dimension_numbers<[1], [0], [0], [1], [0, 0, 1, 1], [], []>} : vector<8x32xf32>, vector<32x32xf32>, vector<8x32xf32> -> vector<8x32xf32>
    %c1_14 = arith.constant 1 : index
    %c0_15 = arith.constant 0 : index
    %c0_16 = arith.constant 0 : index
    %14 = vector.load %arg2[%c1_14, %c0_15, %c0_16] : memref<3x1x32xf32, #tpu.memory_space<vmem>>, vector<1x1x32xf32>
    %15 = vector.shape_cast %14 : vector<1x1x32xf32> to vector<1x32xf32>
    %16 = vector.broadcast %15 : vector<1x32xf32> to vector<8x32xf32>
    %17 = arith.addf %13, %16 : vector<8x32xf32>
    %c2 = arith.constant 2 : index
    %c0_17 = arith.constant 0 : index
    %c0_18 = arith.constant 0 : index
    %18 = vector.load %arg0[%c2, %c0_17, %c0_18] : memref<3x8x32xf32, #tpu.memory_space<vmem>>, vector<1x8x32xf32>
    %19 = vector.shape_cast %18 : vector<1x8x32xf32> to vector<8x32xf32>
    %c2_19 = arith.constant 2 : index
    %c0_20 = arith.constant 0 : index
    %c0_21 = arith.constant 0 : index
    %20 = vector.load %arg1[%c2_19, %c0_20, %c0_21] : memref<3x32x32xf32, #tpu.memory_space<vmem>>, vector<1x32x32xf32>
    %21 = vector.shape_cast %20 : vector<1x32x32xf32> to vector<32x32xf32>
    %cst_22 = arith.constant dense<0.000000e+00> : vector<8x32xf32>
    %22 = tpu.matmul %19, %21, %cst_22 {dimension_numbers = #tpu.dot_dimension_numbers<[1], [0], [0], [1], [0, 0, 1, 1], [], []>} : vector<8x32xf32>, vector<32x32xf32>, vector<8x32xf32> -> vector<8x32xf32>
    %c2_23 = arith.constant 2 : index
    %c0_24 = arith.constant 0 : index
    %c0_25 = arith.constant 0 : index
    %23 = vector.load %arg2[%c2_23, %c0_24, %c0_25] : memref<3x1x32xf32, #tpu.memory_space<vmem>>, vector<1x1x32xf32>
    %24 = vector.shape_cast %23 : vector<1x1x32xf32> to vector<1x32xf32>
    %25 = vector.broadcast %24 : vector<1x32xf32> to vector<8x32xf32>
    %26 = arith.addf %22, %25 : vector<8x32xf32>
    %27 = vector.extract_strided_slice %8 {offsets = [0, 0], sizes = [8, 8], strides = [1, 1]} : vector<8x32xf32> to vector<8x8xf32>
    %cst_26 = arith.constant 0.353553385 : f32
    %28 = vector.broadcast %cst_26 : f32 to vector<8x8xf32>
    %29 = arith.mulf %27, %28 : vector<8x8xf32>
    %30 = vector.extract_strided_slice %17 {offsets = [0, 0], sizes = [8, 8], strides = [1, 1]} : vector<8x32xf32> to vector<8x8xf32>
    %31 = vector.extract_strided_slice %26 {offsets = [0, 0], sizes = [8, 8], strides = [1, 1]} : vector<8x32xf32> to vector<8x8xf32>
    %cst_27 = arith.constant dense<0.000000e+00> : vector<8x8xf32>
    %32 = tpu.matmul %29, %30, %cst_27 {dimension_numbers = #tpu.dot_dimension_numbers<[1], [1], [0], [0], [0, 0, 1, 0], [], []>} : vector<8x8xf32>, vector<8x8xf32>, vector<8x8xf32> -> vector<8x8xf32>
    %cst_28 = arith.constant dense<0xFF800000> : vector<8xf32>
    %33 = vector.multi_reduction <maximumf>, %32, %cst_28 [1] : vector<8x8xf32> to vector<8xf32>
    %34 = vector.shape_cast %33 : vector<8xf32> to vector<8x1xf32>
    %35 = vector.broadcast %34 : vector<8x1xf32> to vector<8x8xf32>
    %36 = arith.subf %32, %35 : vector<8x8xf32>
    %37 = math.exp %36 : vector<8x8xf32>
    %cst_29 = arith.constant dense<0.000000e+00> : vector<8xf32>
    %38 = vector.multi_reduction <add>, %37, %cst_29 [1] : vector<8x8xf32> to vector<8xf32>
    %39 = vector.shape_cast %38 : vector<8xf32> to vector<8x1xf32>
    %40 = tpu.reciprocal %39 {approx = true} : vector<8x1xf32> -> vector<8x1xf32>
    %41 = vector.broadcast %40 : vector<8x1xf32> to vector<8x8xf32>
    %42 = arith.mulf %37, %41 : vector<8x8xf32>
    %cst_30 = arith.constant dense<0.000000e+00> : vector<8x8xf32>
    %43 = tpu.matmul %42, %31, %cst_30 {dimension_numbers = #tpu.dot_dimension_numbers<[1], [0], [0], [1], [0, 0, 1, 1], [], []>} : vector<8x8xf32>, vector<8x8xf32>, vector<8x8xf32> -> vector<8x8xf32>
    %44 = vector.extract_strided_slice %8 {offsets = [0, 8], sizes = [8, 8], strides = [1, 1]} : vector<8x32xf32> to vector<8x8xf32>
    %cst_31 = arith.constant 0.353553385 : f32
    %45 = vector.broadcast %cst_31 : f32 to vector<8x8xf32>
    %46 = arith.mulf %44, %45 : vector<8x8xf32>
    %47 = vector.extract_strided_slice %17 {offsets = [0, 8], sizes = [8, 8], strides = [1, 1]} : vector<8x32xf32> to vector<8x8xf32>
    %48 = vector.extract_strided_slice %26 {offsets = [0, 8], sizes = [8, 8], strides = [1, 1]} : vector<8x32xf32> to vector<8x8xf32>
    %cst_32 = arith.constant dense<0.000000e+00> : vector<8x8xf32>
    %49 = tpu.matmul %46, %47, %cst_32 {dimension_numbers = #tpu.dot_dimension_numbers<[1], [1], [0], [0], [0, 0, 1, 0], [], []>} : vector<8x8xf32>, vector<8x8xf32>, vector<8x8xf32> -> vector<8x8xf32>
    %cst_33 = arith.constant dense<0xFF800000> : vector<8xf32>
    %50 = vector.multi_reduction <maximumf>, %49, %cst_33 [1] : vector<8x8xf32> to vector<8xf32>
    %51 = vector.shape_cast %50 : vector<8xf32> to vector<8x1xf32>
    %52 = vector.broadcast %51 : vector<8x1xf32> to vector<8x8xf32>
    %53 = arith.subf %49, %52 : vector<8x8xf32>
    %54 = math.exp %53 : vector<8x8xf32>
    %cst_34 = arith.constant dense<0.000000e+00> : vector<8xf32>
    %55 = vector.multi_reduction <add>, %54, %cst_34 [1] : vector<8x8xf32> to vector<8xf32>
    %56 = vector.shape_cast %55 : vector<8xf32> to vector<8x1xf32>
    %57 = tpu.reciprocal %56 {approx = true} : vector<8x1xf32> -> vector<8x1xf32>
    %58 = vector.broadcast %57 : vector<8x1xf32> to vector<8x8xf32>
    %59 = arith.mulf %54, %58 : vector<8x8xf32>
    %cst_35 = arith.constant dense<0.000000e+00> : vector<8x8xf32>
    %60 = tpu.matmul %59, %48, %cst_35 {dimension_numbers = #tpu.dot_dimension_numbers<[1], [0], [0], [1], [0, 0, 1, 1], [], []>} : vector<8x8xf32>, vector<8x8xf32>, vector<8x8xf32> -> vector<8x8xf32>
    %61 = vector.extract_strided_slice %8 {offsets = [0, 16], sizes = [8, 8], strides = [1, 1]} : vector<8x32xf32> to vector<8x8xf32>
    %cst_36 = arith.constant 0.353553385 : f32
    %62 = vector.broadcast %cst_36 : f32 to vector<8x8xf32>
    %63 = arith.mulf %61, %62 : vector<8x8xf32>
    %64 = vector.extract_strided_slice %17 {offsets = [0, 16], sizes = [8, 8], strides = [1, 1]} : vector<8x32xf32> to vector<8x8xf32>
    %65 = vector.extract_strided_slice %26 {offsets = [0, 16], sizes = [8, 8], strides = [1, 1]} : vector<8x32xf32> to vector<8x8xf32>
    %cst_37 = arith.constant dense<0.000000e+00> : vector<8x8xf32>
    %66 = tpu.matmul %63, %64, %cst_37 {dimension_numbers = #tpu.dot_dimension_numbers<[1], [1], [0], [0], [0, 0, 1, 0], [], []>} : vector<8x8xf32>, vector<8x8xf32>, vector<8x8xf32> -> vector<8x8xf32>
    %cst_38 = arith.constant dense<0xFF800000> : vector<8xf32>
    %67 = vector.multi_reduction <maximumf>, %66, %cst_38 [1] : vector<8x8xf32> to vector<8xf32>
    %68 = vector.shape_cast %67 : vector<8xf32> to vector<8x1xf32>
    %69 = vector.broadcast %68 : vector<8x1xf32> to vector<8x8xf32>
    %70 = arith.subf %66, %69 : vector<8x8xf32>
    %71 = math.exp %70 : vector<8x8xf32>
    %cst_39 = arith.constant dense<0.000000e+00> : vector<8xf32>
    %72 = vector.multi_reduction <add>, %71, %cst_39 [1] : vector<8x8xf32> to vector<8xf32>
    %73 = vector.shape_cast %72 : vector<8xf32> to vector<8x1xf32>
    %74 = tpu.reciprocal %73 {approx = true} : vector<8x1xf32> -> vector<8x1xf32>
    %75 = vector.broadcast %74 : vector<8x1xf32> to vector<8x8xf32>
    %76 = arith.mulf %71, %75 : vector<8x8xf32>
    %cst_40 = arith.constant dense<0.000000e+00> : vector<8x8xf32>
    %77 = tpu.matmul %76, %65, %cst_40 {dimension_numbers = #tpu.dot_dimension_numbers<[1], [0], [0], [1], [0, 0, 1, 1], [], []>} : vector<8x8xf32>, vector<8x8xf32>, vector<8x8xf32> -> vector<8x8xf32>
    %78 = vector.extract_strided_slice %8 {offsets = [0, 24], sizes = [8, 8], strides = [1, 1]} : vector<8x32xf32> to vector<8x8xf32>
    %cst_41 = arith.constant 0.353553385 : f32
    %79 = vector.broadcast %cst_41 : f32 to vector<8x8xf32>
    %80 = arith.mulf %78, %79 : vector<8x8xf32>
    %81 = vector.extract_strided_slice %17 {offsets = [0, 24], sizes = [8, 8], strides = [1, 1]} : vector<8x32xf32> to vector<8x8xf32>
    %82 = vector.extract_strided_slice %26 {offsets = [0, 24], sizes = [8, 8], strides = [1, 1]} : vector<8x32xf32> to vector<8x8xf32>
    %cst_42 = arith.constant dense<0.000000e+00> : vector<8x8xf32>
    %83 = tpu.matmul %80, %81, %cst_42 {dimension_numbers = #tpu.dot_dimension_numbers<[1], [1], [0], [0], [0, 0, 1, 0], [], []>} : vector<8x8xf32>, vector<8x8xf32>, vector<8x8xf32> -> vector<8x8xf32>
    %cst_43 = arith.constant dense<0xFF800000> : vector<8xf32>
    %84 = vector.multi_reduction <maximumf>, %83, %cst_43 [1] : vector<8x8xf32> to vector<8xf32>
    %85 = vector.shape_cast %84 : vector<8xf32> to vector<8x1xf32>
    %86 = vector.broadcast %85 : vector<8x1xf32> to vector<8x8xf32>
    %87 = arith.subf %83, %86 : vector<8x8xf32>
    %88 = math.exp %87 : vector<8x8xf32>
    %cst_44 = arith.constant dense<0.000000e+00> : vector<8xf32>
    %89 = vector.multi_reduction <add>, %88, %cst_44 [1] : vector<8x8xf32> to vector<8xf32>
    %90 = vector.shape_cast %89 : vector<8xf32> to vector<8x1xf32>
    %91 = tpu.reciprocal %90 {approx = true} : vector<8x1xf32> -> vector<8x1xf32>
    %92 = vector.broadcast %91 : vector<8x1xf32> to vector<8x8xf32>
    %93 = arith.mulf %88, %92 : vector<8x8xf32>
    %cst_45 = arith.constant dense<0.000000e+00> : vector<8x8xf32>
    %94 = tpu.matmul %93, %82, %cst_45 {dimension_numbers = #tpu.dot_dimension_numbers<[1], [0], [0], [1], [0, 0, 1, 1], [], []>} : vector<8x8xf32>, vector<8x8xf32>, vector<8x8xf32> -> vector<8x8xf32>
    %95 = tpu.concatenate %43, %60, %77, %94 in 1 : vector<8x8xf32>, vector<8x8xf32>, vector<8x8xf32>, vector<8x8xf32> -> vector<8x32xf32>
    %c0_46 = arith.constant 0 : index
    %c0_47 = arith.constant 0 : index
    %96 = vector.load %arg3[%c0_46, %c0_47] : memref<32x32xf32, #tpu.memory_space<vmem>>, vector<32x32xf32>
    %cst_48 = arith.constant dense<0.000000e+00> : vector<8x32xf32>
    %97 = tpu.matmul %95, %96, %cst_48 {dimension_numbers = #tpu.dot_dimension_numbers<[1], [0], [0], [1], [0, 0, 1, 1], [], []>} : vector<8x32xf32>, vector<32x32xf32>, vector<8x32xf32> -> vector<8x32xf32>
    %c0_49 = arith.constant 0 : index
    %c0_50 = arith.constant 0 : index
    %98 = vector.load %arg4[%c0_49, %c0_50] : memref<1x32xf32, #tpu.memory_space<vmem>>, vector<1x32xf32>
    %99 = vector.broadcast %98 : vector<1x32xf32> to vector<8x32xf32>
    %100 = arith.addf %97, %99 : vector<8x32xf32>
    %c0_51 = arith.constant 0 : index
    %c0_52 = arith.constant 0 : index
    %101 = vector.load %arg5[%c0_51, %c0_52] : memref<8x32xf32, #tpu.memory_space<vmem>>, vector<8x32xf32>
    tpu.vector_store %arg5[%c0_51, %c0_52], %100 {strides = array<i32>} : memref<8x32xf32, #tpu.memory_space<vmem>>, vector<8x32xf32>,
    return
  }
}

</mosaic_0001>

<bundles_post_ra>
// kernel: tpu_custom_call.1
= control target key start
LH: loop header
LB: loop body
LE: loop exit
PB: predicated region body
PF: predicated region fallthrough
CT: control target
= control target key end

     0   :  { %10 = vsyncpa [#allocation3], 0  ;;  %s793_s0 = inlined_call_operand.hbm [shape: f32[3,8,32], index: 0, kind: input, shape index: {}]   ;;  %s794_s1 = inlined_call_operand.hbm [shape: f32[3,32,32], index: 1, kind: input, shape index: {}]   ;;  %s795_s2 = inlined_call_operand.hbm [shape: f32[3,1,32], index: 2, kind: input, shape index: {}]   ;;  %s796_s3 = inlined_call_operand.hbm [shape: f32[32,32], index: 3, kind: input, shape index: {}]   ;;  %s797_s4 = inlined_call_operand.vmem [shape: f32[1,32], index: 4, kind: input, shape index: {}]   ;;  %s798_s5 = inlined_call_operand.hbm [shape: f32[8,32], index: 5, kind: output, shape index: {}]  }
   0x1   :  { %11 = vsyncpa [#allocation6], 0 }
   0x2   :  { %12 = vsyncpa [#allocation9], 0 }
   0x3   :  { %13 = vsyncpa [#allocation4], 0  ;;  %s31_s20 = sshll.u32 %s794_s1, 4  ;;  %s690_s21 = smov [#allocation5]   ;;  %s32_s20 = int_to_ptr.hbm [resolvable:$true] %s31_s20 }
   0x4   :  { %s33_s22 = sshll.u32 %s690_s21, 4  ;;  %s18_s25 = sshll.u32 %s793_s0, 4  ;;  %s34_s22 = int_to_ptr.vmem [resolvable:$true] %s33_s22  ;;  %s19_s25 = int_to_ptr.hbm [resolvable:$true] %s18_s25 }
   0x5   :  { %s691_s26 = smov 128   ;;  %s692_s27 = smov 8  }
   0x6   :  { %39 = dma.hbm_to_vmem [thread:$0]  %s32_s20, 1536, %s34_s22, [#allocation6], %s691_s26, %s691_s26, %s692_s27  }
   0x7   :  { %s693_s28 = smov [#allocation2]   ;;  %s44_s7 = sshll.u32 %s795_s2, 4  ;;  %s45_s7 = int_to_ptr.hbm [resolvable:$true] %s44_s7 }
   0x8   :  { %s20_s29 = sshll.u32 %s693_s28, 4  ;;  %s694_s1 = smov [#allocation7]   ;;  %s21_s29 = int_to_ptr.vmem [resolvable:$true] %s20_s29 }
   0x9   :  { %26 = dma.hbm_to_vmem [thread:$0]  %s19_s25, 384, %s21_s29, [#allocation3], %s691_s26, %s691_s26, %s692_s27  }
   0xa   :  { %s46_s8 = sshll.u32 %s694_s1, 4  ;;  %s57_s10 = sshll.u32 %s796_s3, 4  ;;  %s47_s8 = int_to_ptr.vmem [resolvable:$true] %s46_s8  ;;  %s58_s10 = int_to_ptr.hbm [resolvable:$true] %s57_s10 }
   0xb   :  { %s695_s11 = smov 16   ;;  %s696_s12 = smov 1  }
   0xc   :  { %52 = dma.hbm_to_vmem [thread:$0]  %s45_s7, 48, %s47_s8, [#allocation6], %s695_s11, %s695_s11, %s696_s12  }
   0xd   :  { %s697_s13 = smov [#allocation8]  }
   0xe   :  { %s59_s14 = sshll.u32 %s697_s13, 4  ;;  %s60_s14 = int_to_ptr.vmem [resolvable:$true] %s59_s14 }
   0xf   :  { %65 = dma.hbm_to_vmem [thread:$0]  %s58_s10, 512, %s60_s14, [#allocation9], %s691_s26, %s691_s26, %s692_s27  }
  0x10   :  { %682 = dma.done.wait [#allocation3], 384  }
  0x11   :  { %683 = vsyncadd [#allocation3], 4294966912 }
  0x12   :  { %684 = dma.done.wait [#allocation6], 1584  }
  0x13   :  { %685 = vsyncadd [#allocation6], 4294965712 }
  0x14   :  { %686 = dma.done.wait [#allocation9], 512  }
  0x15   :  { %687 = vsyncadd [#allocation9], 4294966784  ;;  %v123_v0 = vld [vmem:[#allocation5 + $0x38] sm:$0xff]  ;;  %v122_v2 = vld [vmem:[#allocation5 + $0x30] sm:$0xff]  ;;  %vm93_vm0 = vcmask 261120   ;;  %vm188_vm1 = vcmask 64512  }
  0x16   :  { %v88_v1 = vld [vmem:[#allocation5 + $0x18] sm:$0xff]  ;;  %144 = vmatpush.msra.mxu1 %v123_v0  ;;  %v87_v3 = vld [vmem:[#allocation5 + $0x10] sm:$0xff]  ;;  %v121_v4 = vld [vmem:[#allocation5 + $0x28] sm:$0xff]  ;;  %s698_s2 = smov 104   ;;  %s699_s3 = smov 120   ;;  %vm458_vm2 = vcmask 130048  }
  0x17   :  { %109 = vmatpush.msra.mxu0 %v88_v1  ;;  %v86_v5 = vld [vmem:[#allocation5 + $0x8] sm:$0xff]  ;;  %v120_v6 = vld [vmem:[#allocation5 + $0x20] sm:$0xff]  ;;  %v118_v8 = vld [vmem:[#allocation2 + $0x8] sm:$0xff]  ;;  %s700_s15 = smov 112   ;;  %s701_s16 = smov 24   ;;  %vm460_vm3 = vcmask 195584  }
  0x18   :  { %145 = vmatpush.msra.mxu1 %v122_v2  ;;  %v85_v7 = vld [vmem:[#allocation5] sm:$0xff]  ;;  %v84_v9 = vld [vmem:[#allocation2] sm:$0xff]  ;;  %v158_v17 = vld [vmem:[#allocation5 + $0x58] sm:$0xff]  ;;  %s702_s19 = smov [#allocation10]   ;;  %s501_s23 = sshll.u32 %s798_s5, 4  ;;  %s502_s23 = int_to_ptr.hbm [resolvable:$true] %s501_s23 }
  0x19   :  { %110 = vmatpush.msra.mxu0 %v87_v3  ;;  %v542_v10 = vld [vmem:[#allocation7 + $0x1] ss:$0 sm:$0xff]  ;;  %v543_v11 = vld [vmem:[#allocation7] ss:$0 sm:$0xff]  ;;  %v157_v18 = vld [vmem:[#allocation5 + $0x50] sm:$0xff]  ;;  %179 = vmatpush.msra.mxu2 %v158_v17  ;;  %s499_s20 = sshll.u32 %s702_s19, 4  ;;  %s500_s20 = int_to_ptr.vmem [resolvable:$true] %s499_s20 }
  0x1a   :  { %146 = vmatpush.msra.mxu1 %v121_v4  ;;  %v156_v19 = vld [vmem:[#allocation5 + $0x48] sm:$0xff]  ;;  %v155_v20 = vld [vmem:[#allocation5 + $0x40] sm:$0xff]  ;;  %v153_v21 = vld [vmem:[#allocation2 + $0x10] sm:$0xff] }
  0x1b   :  { %111 = vmatpush.msra.mxu0 %v86_v5  ;;  %180 = vmatpush.msra.mxu2 %v157_v18  ;;  %v544_v30 = vld [vmem:[#allocation7 + $0x2] ss:$0 sm:$0xff]  ;;  %v462_v17 = vld [vmem:[#allocation8] sm:$0xff] }
  0x1c   :  { %147 = vmatpush.msra.mxu1 %v120_v6 }
  0x1d   :  { %112 = vmatpush.msra.mxu0 %v85_v7  ;;  %514 = vmatmul.msk.f32.vlgmr.msra.gmra.mxu1 %vm93_vm0, %v118_v8 }
  0x1e   :  { %513 = vmatmul.msk.f32.vlgmr.msra.gmra.mxu0 %vm93_vm0, %v84_v9  ;;  %181 = vmatpush.msra.mxu2 %v156_v19 }
  0x20   :  { %182 = vmatpush.msra.mxu2 %v155_v20 }
  0x21   :  { %515 = vmatmul.msk.f32.vlgmr.msra.gmra.mxu2 %vm93_vm0, %v153_v21 }
  0x9a   :  { %v149_v12 = vpop.f32.mrf.mxu1 }
  0x9b   :  { %v114_v13 = vpop.f32.mrf.mxu0  ;;  %v150_v14 = vadd.f32 %v542_v10, %v149_v12 }
  0x9c   :  { %v115_v15 = vadd.f32 %v543_v11, %v114_v13 }
  0x9d   :  { %382 = vrot.lane.b32.xlu2 %v150_v14, %s698_s2  ;;  %251 = vrot.lane.b32.xlu1 %v150_v14, %s699_s3 }
  0x9e   :  { %v187_v16 = vmul.f32 0.35355338, %v115_v15  ;;  %317 = vrot.lane.b32.xlu0 %v150_v14, %s700_s15  ;;  %516 = vmatpush.xpose.msk.msra.mxu3 %vm188_vm1, %v150_v14  ;;  %v465_v14 = vld [vmem:[#allocation8 + $0x18] sm:$0xff]  ;;  %v464_v15 = vld [vmem:[#allocation8 + $0x10] sm:$0xff] }
  0xa1   :  { %517 = vmatmul.msk.f32.vlgmr.msra.gmra.mxu3 %vm188_vm1, %v187_v16 }
  0xa4   :  { %v184_v31 = vpop.f32.mrf.mxu2 }
  0xa5   :  { %380 = vrot.lane.b32.xlu2 %v187_v16, %s698_s2  ;;  %249 = vrot.lane.b32.xlu1 %v187_v16, %s699_s3  ;;  %v185_v32 = vadd.f32 %v544_v30, %v184_v31 }
  0xa6   :  { %315 = vrot.lane.b32.xlu0 %v187_v16, %s700_s15  ;;  %v463_v16 = vld [vmem:[#allocation8 + $0x8] sm:$0xff] }
  0xa7   :  { %244 = vmatpush.msrb.mxu3 %v185_v32 }
  0xf7   :  { %v383_v23 = vpop.permute.xlu2 %382 }
  0xff   :  { %v381_v27 = vpop.permute.xlu2 %380 }
 0x10f   :  { %v252_v22 = vpop.permute.xlu1 %251 }
 0x110   :  { %v318_v24 = vpop.permute.xlu0 %317  ;;  %519 = vmatpush.xpose.msk.msrb.mxu0 %vm188_vm1, %v252_v22 }
 0x111   :  { %522 = vmatpush.xpose.msk.msrb.mxu2 %vm188_vm1, %v318_v24  ;;  %v545_v24 = vld [vmem:[%s797_s4] ss:$0 sm:$0xff] }
 0x114   :  { %525 = vmatpush.xpose.msk.msra.mxu0 %vm188_vm1, %v383_v23 }
 0x115   :  { %485 = vmatpush.msra.mxu2 %v465_v14 }
 0x117   :  { %v250_v25 = vpop.permute.xlu1 %249  ;;  %486 = vmatpush.msra.mxu2 %v464_v15 }
 0x118   :  { %v316_v26 = vpop.permute.xlu0 %315  ;;  %520 = vmatmul.msk.f32.vlgmr.msrb.gmra.mxu0 %vm188_vm1, %v250_v25 }
 0x119   :  { %523 = vmatmul.msk.f32.vlgmr.msrb.gmra.mxu2 %vm188_vm1, %v316_v26 }
 0x11a   :  { %487 = vmatpush.msra.mxu2 %v463_v16 }
 0x11c   :  { %488 = vmatpush.msra.mxu2 %v462_v17 }
 0x120   :  { %526 = vmatmul.msk.f32.vlgmr.msra.gmra.mxu0 %vm188_vm1, %v381_v27 }
 0x124   :  { %v212_v28 = vpop.f32.mrf.mxu3 }
 0x125   :  { %v215_v29 = vsel %vm188_vm1, %v212_v28, -inf }
 0x126   :  { %216 = vmax.xlane.f32.xlu0 %v215_v29 }
 0x195   :  { %v274_v33 = vpop.f32.mrf.mxu0 }
 0x196   :  { %v277_v34 = vsel %vm188_vm1, %v274_v33, -inf }
 0x197   :  { %278 = vmax.xlane.f32.xlu1 %v277_v34 }
 0x199   :  { %v217_v35 = vpop.xlane.xlu0 %216 }
 0x19a   :  { %v218_v36 = vsub.f32 %v212_v28, %v217_v35 }
 0x19c   :  { %v219_v37 = vmul.f32 1.442695, %v218_v36  ;;  %v340_v38 = vpop.f32.mrf.mxu2 }
 0x19d   :  { %v343_v39 = vsel %vm188_vm1, %v340_v38, -inf  ;;  %v405_v40 = vpop.f32.mrf.mxu0 }
 0x19e   :  { %546 = vpow2.f32 %v219_v37  ;;  %344 = vmax.xlane.f32.xlu2 %v343_v39  ;;  %v408_v42 = vsel %vm188_vm1, %v405_v40, -inf }
 0x1a4   :  { %v547_v41 = vpop.eup %546 }
 0x1a5   :  { %v221_v43 = vsel %vm188_vm1, %v547_v41, 0.0 }
 0x1a6   :  { %409 = vmax.xlane.f32.xlu2 %v408_v42  ;;  %222 = vadd.xlane.f32.xlu0 %v221_v43 }
 0x20a   :  { %v279_v44 = vpop.xlane.xlu1 %278 }
 0x20b   :  { %v280_v45 = vsub.f32 %v274_v33, %v279_v44 }
 0x20d   :  { %v281_v46 = vmul.f32 1.442695, %v280_v45 }
 0x20f   :  { %548 = vpow2.f32 %v281_v46 }
 0x211   :  { %v345_v47 = vpop.xlane.xlu2 %344 }
 0x212   :  { %v346_v48 = vsub.f32 %v340_v38, %v345_v47 }
 0x214   :  { %v347_v49 = vmul.f32 1.442695, %v346_v48 }
 0x215   :  { %v549_v50 = vpop.eup %548 }
 0x216   :  { %550 = vpow2.f32 %v347_v49  ;;  %v283_v51 = vsel %vm188_vm1, %v549_v50, 0.0 }
 0x217   :  { %284 = vadd.xlane.f32.xlu1 %v283_v51 }
 0x219   :  { %v410_v52 = vpop.xlane.xlu2 %409  ;;  %v223_v53 = vpop.xlane.xlu0 %222 }
 0x21a   :  { %v411_v54 = vsub.f32 %v405_v40, %v410_v52  ;;  %552 = vrcp.f32 %v223_v53 }
 0x21c   :  { %v551_v55 = vpop.eup %550  ;;  %v412_v56 = vmul.f32 1.442695, %v411_v54 }
 0x21d   :  { %v349_v57 = vsel %vm188_vm1, %v551_v55, 0.0 }
 0x21e   :  { %554 = vpow2.f32 %v412_v56  ;;  %350 = vadd.xlane.f32.xlu2 %v349_v57 }
 0x220   :  { %v553_v58 = vpop.eup %552 }
 0x221   :  { %v225_v59 = vmul.f32 %v553_v58, %v547_v41 }
 0x223   :  { %518 = vmatmul.msk.f32.vlgmr.msrb.gmra.mxu3 %vm188_vm1, %v225_v59 }
 0x224   :  { %v555_v60 = vpop.eup %554 }
 0x225   :  { %v414_v61 = vsel %vm188_vm1, %v555_v60, 0.0 }
 0x226   :  { %415 = vadd.xlane.f32.xlu0 %v414_v61 }
 0x230   :  { %289 = vrot.lane.b32.xlu1 %v185_v32, %s699_s3 }
 0x236   :  { %354 = vrot.lane.b32.xlu2 %v185_v32, %s700_s15 }
 0x23a   :  { %419 = vrot.lane.b32.xlu0 %v185_v32, %s698_s2 }
 0x28a   :  { %v285_v63 = vpop.xlane.xlu1 %284 }
 0x291   :  { %v351_v62 = vpop.xlane.xlu2 %350 }
 0x292   :  { %556 = vrcp.f32 %v351_v62 }
 0x293   :  { %558 = vrcp.f32 %v285_v63 }
 0x298   :  { %v557_v0 = vpop.eup %556 }
 0x299   :  { %v353_v1 = vmul.f32 %v557_v0, %v551_v55  ;;  %v355_v2 = vpop.permute.xlu2 %354  ;;  %v559_v3 = vpop.eup %558 }
 0x29a   :  { %375 = vmatpush.msra.mxu3 %v355_v2  ;;  %v416_v4 = vpop.xlane.xlu0 %415  ;;  %v287_v6 = vmul.f32 %v559_v3, %v549_v50 }
 0x29b   :  { %524 = vmatmul.msk.f32.vlgmr.msra.gmra.mxu3 %vm188_vm1, %v353_v1  ;;  %560 = vrcp.f32 %v416_v4 }
 0x2a1   :  { %v561_v7 = vpop.eup %560 }
 0x2a2   :  { %v290_v5 = vpop.permute.xlu1 %289  ;;  %v418_v8 = vmul.f32 %v561_v7, %v555_v60 }
 0x2a3   :  { %310 = vmatpush.msrb.mxu1 %v290_v5 }
 0x2a4   :  { %521 = vmatmul.msk.f32.vlgmr.msrb.gmra.mxu1 %vm188_vm1, %v287_v6 }
 0x2a6   :  { %v246_v10 = vpop.f32.mrf.mxu3 }
 0x2ac   :  { %v420_v9 = vpop.permute.xlu0 %419 }
 0x2ad   :  { %440 = vmatpush.msra.mxu1 %v420_v9 }
 0x2ae   :  { %527 = vmatmul.msk.f32.vlgmr.msra.gmra.mxu1 %vm188_vm1, %v418_v8 }
 0x31e   :  { %v377_v11 = vpop.f32.mrf.mxu3 }
 0x31f   :  { %450 = vrot.lane.b32.xlu0 %v377_v11, %s695_s11 }
 0x321   :  { %v312_v12 = vpop.f32.mrf.mxu1 }
 0x322   :  { %446 = vrot.lane.b32.xlu1 %v312_v12, %s692_s27 }
 0x32b   :  { %v442_v13 = vpop.f32.mrf.mxu1 }
 0x32c   :  { %454 = vrot.lane.b32.xlu2 %v442_v13, %s701_s16 }
 0x386   :  { %v455_v21 = vpop.permute.xlu2 %454 }
 0x391   :  { %v451_v19 = vpop.permute.xlu0 %450 }
 0x394   :  { %v447_v18 = vpop.permute.xlu1 %446 }
 0x395   :  { %v457_v20 = vsel %vm188_vm1, %v246_v10, %v447_v18 }
 0x396   :  { %v459_v22 = vsel %vm458_vm2, %v457_v20, %v451_v19 }
 0x397   :  { %v461_v23 = vsel %vm460_vm3, %v459_v22, %v455_v21 }
 0x398   :  { %528 = vmatmul.msk.f32.vlgmr.msra.gmra.mxu2 %vm93_vm0, %v461_v23 }
 0x41b   :  { %v490_v25 = vpop.f32.mrf.mxu2 }
 0x41c   :  { %v491_v26 = vadd.f32 %v545_v24, %v490_v25 }
 0x41e   :  { %493 = vst.msk [vmem:[#allocation10] sm:$0xff] %vm93_vm0, %v491_v26 }
 0x41f   :  { %504 = dma.vmem_to_hbm [thread:$0]  %s500_s20, 128, %s502_s23, [#allocation4]  }
 0x420   :  { %688 = dma.done.wait [#allocation4], 128  }
 0x421   :  { %689 = vsyncadd [#allocation4], 4294967168 }
 0x422   :  { %509 = vsyncpa [#allocation3], 1 }
 0x423   :  { %510 = vsyncpa [#allocation6], 1 }
 0x424   :  { %511 = vsyncpa [#allocation9], 1 }
 0x425   :  { %512 = vsyncpa [#allocation4], 1 }

</bundles_post_ra>
